<compile_context>
chip_gen: v5e
topology: v5e:2x2
jax: 0.10.0
libtpu: 0.0.40
codegen_flags: <defaults>
</compile_context>

<pallas_src>
import functools

import jax
import jax.numpy as jnp
from jax import lax
from jax.experimental import pallas as pl
from jax.experimental.pallas import tpu as pltpu

_LANES = 128


def _round_up(x, m):
    return ((x + m - 1) // m) * m


def _fused_conv_bn_relu_kernel(p_ref, w_ref, b_ref, g_ref, bt_ref, o_ref, *,
                               inv_m, eps, has_bn, has_relu):
    # p_ref : (M, Kp)     im2col patch slab (bf16), same block every step
    # w_ref : (Kp, 128)   folded conv weights for this channel tile (bf16)
    # b_ref : (1, 128)    effective conv bias   (f32)
    # g_ref : (1, 128)    BN gamma              (f32)
    # bt_ref: (1, 128)    BN beta               (f32)
    # o_ref : (M, 128)    output tile           (f32)

    # Single lane-dense MXU matmul over the full K = KH*KW*Cin contraction.
    acc = jnp.dot(p_ref[...], w_ref[...], preferred_element_type=jnp.float32)

    if has_bn:
        # Training-mode BN, single pass over the activations:
        #   mean = E[y], var = E[y^2] - mean^2  (conv bias omitted: it is
        #   exactly cancelled by the mean subtraction and does not affect var)
        s1 = jnp.sum(acc, axis=0, keepdims=True)          # (1, 128)
        s2 = jnp.sum(acc * acc, axis=0, keepdims=True)    # (1, 128)
        mean = s1 * inv_m
        var = s2 * inv_m - mean * mean
        scale = g_ref[...] * lax.rsqrt(var + eps)         # EUP rsqrt
        shift = bt_ref[...] - mean * scale
        y = acc * scale + shift                           # one fused FMA pass
    else:
        y = acc + b_ref[...]

    if has_relu:
        y = jnp.maximum(y, 0.0)

    o_ref[...] = y                                        # lane-dense 2D store


def conv_bn_reluv1_forward(x_nchw, w_dw, b_dw, w_pw, b_pw, gamma, beta, *,
                           stride=1, padding=1, eps=1e-5,
                           has_bn=True, has_relu=True,
                           mxu_dtype=jnp.bfloat16):
    N, Cin, H, W = x_nchw.shape
    Cout = w_pw.shape[0]
    KH, KW = w_dw.shape[2], w_dw.shape[3]
    Ho = (H + 2 * padding - KH) // stride + 1
    Wo = (W + 2 * padding - KW) // stride + 1
    M = N * Ho * Wo
    Kd = KH * KW * Cin
    f32 = jnp.float32

    # ---- fold depthwise + pointwise params into one dense conv (tiny) ------
    w_dw_k = jnp.transpose(w_dw[:, 0].astype(f32), (1, 2, 0))       # (KH,KW,Cin)
    w_pw_m = jnp.transpose(w_pw[:, :, 0, 0].astype(f32), (1, 0))    # (Cin,Cout)
    w_eff = w_dw_k[..., None] * w_pw_m[None, None]                  # (KH,KW,Cin,Cout)
    b_eff = b_dw.astype(f32) @ w_pw_m + b_pw.astype(f32)            # (Cout,)

    # ---- im2col patch slab (transpose+pad+gather are one fused XLA producer;
    #      the input is only N*Cin*H*W*4 bytes, so this round trip is tiny) ---
    x_nhwc = jnp.transpose(x_nchw, (0, 2, 3, 1)).astype(f32)
    xp = jnp.pad(x_nhwc, ((0, 0), (padding, padding), (padding, padding), (0, 0)))
    taps = []
    for kh in range(KH):
        for kw in range(KW):
            taps.append(lax.slice(
                xp, (0, kh, kw, 0),
                (N, kh + (Ho - 1) * stride + 1, kw + (Wo - 1) * stride + 1, Cin),
                (1, stride, stride, 1)))
    patches = jnp.concatenate(taps, axis=-1).reshape(M, Kd)   # feature = (kh*KW+kw)*Cin+c

    # ---- pad to TPU-friendly shapes: lane-dense Cout, packed contraction ---
    Kp = _round_up(Kd, 16)                 # bf16 sublane packing
    Cp = _round_up(Cout, _LANES)           # 8 -> 128 lanes
    patches = jnp.pad(patches, ((0, 0), (0, Kp - Kd))).astype(mxu_dtype)
    w_mat = jnp.pad(w_eff.reshape(Kd, Cout),
                    ((0, Kp - Kd), (0, Cp - Cout))).astype(mxu_dtype)
    b2 = jnp.pad(b_eff, (0, Cp - Cout)).reshape(1, Cp).astype(f32)
    g2 = jnp.pad(gamma.astype(f32), (0, Cp - Cout)).reshape(1, Cp)
    bt2 = jnp.pad(beta.astype(f32), (0, Cp - Cout)).reshape(1, Cp)

    kernel = functools.partial(_fused_conv_bn_relu_kernel,
                               inv_m=1.0 / M, eps=eps,
                               has_bn=has_bn, has_relu=has_relu)

    # Explicit VMEM budget: double-buffered pipeline blocks + headroom for
    # in-kernel f32 temporaries.  Stays well under v7x's 64 MiB / v5e's 16 MiB
    # scoped default at these sizes.
    itemsize = jnp.dtype(mxu_dtype).itemsize
    per_step = (M * Kp * itemsize + Kp * _LANES * itemsize
                + 3 * _LANES * 4 + M * _LANES * 4)
    vmem_limit = int(2 * per_step) + (8 << 20)

    # Grid: parallel over 128-wide output-channel tiles (BN stats are exact
    # per channel, so this tiling is safe and uses both TCs when Cout > 128).
    # NOTE: for large M, switch to a two-pass BN (conv+stats pass, then
    # normalize+ReLU pass) with an M-parallel grid; at M=512 the single fused
    # launch is faster than two launches + an HBM round trip.
    n_ct = Cp // _LANES
    out2d = pl.pallas_call(
        kernel,
        out_shape=jax.ShapeDtypeStruct((M, Cp), f32),
        grid_spec=pltpu.PrefetchScalarGridSpec(
            num_scalar_prefetch=0,
            grid=(n_ct,),
            in_specs=[
                pl.BlockSpec((M, Kp), lambda j: (0, 0)),
                pl.BlockSpec((Kp, _LANES), lambda j: (0, j)),
                pl.BlockSpec((1, _LANES), lambda j: (0, j)),
                pl.BlockSpec((1, _LANES), lambda j: (0, j)),
                pl.BlockSpec((1, _LANES), lambda j: (0, j)),
            ],
            out_specs=pl.BlockSpec((M, _LANES), lambda j: (0, j)),
        ),
        compiler_params=pltpu.CompilerParams(
            dimension_semantics=("parallel",),
            vmem_limit_bytes=vmem_limit),
    )(patches, w_mat, b2, g2, bt2)

    # Wrapper-side layout plumbing back to the PyTorch NCHW convention.
    out = out2d[:, :Cout].reshape(N, Ho, Wo, Cout)
    return jnp.transpose(out, (0, 3, 1, 2))


def _reference(x, w_dw, b_dw, w_pw, b_pw, gamma, beta, *, stride, padding, eps,
               has_bn=True, has_relu=True):
    # pure-JAX, full-f32 rendition of the module's forward
    y = lax.conv_general_dilated(
        x, w_dw, window_strides=(stride, stride),
        padding=[(padding, padding), (padding, padding)],
        dimension_numbers=("NCHW", "OIHW", "NCHW"),
        feature_group_count=x.shape[1])
    y = y + b_dw[None, :, None, None]
    y = lax.conv_general_dilated(
        y, w_pw, window_strides=(1, 1), padding=[(0, 0), (0, 0)],
        dimension_numbers=("NCHW", "OIHW", "NCHW"))
    y = y + b_pw[None, :, None, None]
    if has_bn:
        mean = jnp.mean(y, axis=(0, 2, 3), keepdims=True)
        var = jnp.mean((y - mean) ** 2, axis=(0, 2, 3), keepdims=True)
        y = (y - mean) * lax.rsqrt(var + eps)
        y = y * gamma[None, :, None, None] + beta[None, :, None, None]
    if has_relu:
        y = jnp.maximum(y, 0.0)
    return y


if __name__ == "__main__":
    N, Cin, H, W = 2, 4, 16, 16
    Cout, K, stride, padding = 8, 3, 1, 1

    key = jax.random.PRNGKey(0)
    kx, k1, k2, k3, k4, kg, kb = jax.random.split(key, 7)
    x = jax.random.normal(kx, (N, Cin, H, W), jnp.float32)
    w_dw = 0.3 * jax.random.normal(k1, (Cin, 1, K, K), jnp.float32)   # depthwise
    b_dw = 0.1 * jax.random.normal(k2, (Cin,), jnp.float32)
    w_pw = 0.5 * jax.random.normal(k3, (Cout, Cin, 1, 1), jnp.float32)  # 1x1
    b_pw = 0.1 * jax.random.normal(k4, (Cout,), jnp.float32)
    gamma = 1.0 + 0.1 * jax.random.normal(kg, (Cout,), jnp.float32)
    beta = 0.1 * jax.random.normal(kb, (Cout,), jnp.float32)

    out = conv_bn_reluv1_forward(x, w_dw, b_dw, w_pw, b_pw, gamma, beta,
                                 stride=stride, padding=padding)
    out = jax.block_until_ready(out)

    ref = _reference(x, w_dw, b_dw, w_pw, b_pw, gamma, beta,
                     stride=stride, padding=padding, eps=1e-5)
    assert out.shape == ref.shape
    # tolerance sized for bf16 MXU operands (accumulation, BN, ReLU are f32)
    assert jnp.allclose(out, ref, atol=5e-2, rtol=5e-2), "mismatch vs reference"

    print("KERNEL_OK")
</pallas_src>

<mosaic_0001>
module attributes {stable_mosaic.version = 11 : i64} {
  func.func @_fused_conv_bn_relu_kernel(%arg0: i32, %arg1: memref<512x48xbf16, #tpu.memory_space<vmem>>, %arg2: memref<48x128xbf16, #tpu.memory_space<vmem>>, %arg3: memref<1x128xf32, #tpu.memory_space<vmem>>, %arg4: memref<1x128xf32, #tpu.memory_space<vmem>>, %arg5: memref<1x128xf32, #tpu.memory_space<vmem>>, %arg6: memref<512x128xf32, #tpu.memory_space<vmem>>) attributes {dimension_semantics = [#tpu.dimension_semantics<parallel>], iteration_bounds = array<i64: 1>, scalar_prefetch = 0 : i64, scratch_operands = 0 : i64, tpu.core_type = #tpu.core_type<tc>, window_params = [{pipeline_mode = #tpu.pipeline_mode<synchronous>, transform_indices = @transform_0, window_bounds = array<i64: 512, 48>}, {transform_indices = @transform_1, window_bounds = array<i64: 48, 128>}, {transform_indices = @transform_2, window_bounds = array<i64: 1, 128>}, {transform_indices = @transform_3, window_bounds = array<i64: 1, 128>}, {transform_indices = @transform_4, window_bounds = array<i64: 1, 128>}, {transform_indices = @transform_5, window_bounds = array<i64: 512, 128>}]} {
    %c0 = arith.constant 0 : index
    %c0_0 = arith.constant 0 : index
    %0 = vector.load %arg1[%c0, %c0_0] : memref<512x48xbf16, #tpu.memory_space<vmem>>, vector<512x48xbf16>
    %c0_1 = arith.constant 0 : index
    %c0_2 = arith.constant 0 : index
    %1 = vector.load %arg2[%c0_1, %c0_2] : memref<48x128xbf16, #tpu.memory_space<vmem>>, vector<48x128xbf16>
    %cst = arith.constant dense<0.000000e+00> : vector<512x128xf32>
    %2 = tpu.matmul %0, %1, %cst {dimension_numbers = #tpu.dot_dimension_numbers<[1], [0], [0], [1], [0, 0, 1, 1], [], []>} : vector<512x48xbf16>, vector<48x128xbf16>, vector<512x128xf32> -> vector<512x128xf32>
    %cst_3 = arith.constant dense<0.000000e+00> : vector<128xf32>
    %3 = vector.multi_reduction <add>, %2, %cst_3 [0] : vector<512x128xf32> to vector<128xf32>
    %4 = vector.shape_cast %3 : vector<128xf32> to vector<1x128xf32>
    %5 = arith.mulf %2, %2 : vector<512x128xf32>
    %cst_4 = arith.constant dense<0.000000e+00> : vector<128xf32>
    %6 = vector.multi_reduction <add>, %5, %cst_4 [0] : vector<512x128xf32> to vector<128xf32>
    %7 = vector.shape_cast %6 : vector<128xf32> to vector<1x128xf32>
    %cst_5 = arith.constant 0.001953125 : f32
    %8 = vector.broadcast %cst_5 : f32 to vector<1x128xf32>
    %9 = arith.mulf %4, %8 : vector<1x128xf32>
    %cst_6 = arith.constant 0.001953125 : f32
    %10 = vector.broadcast %cst_6 : f32 to vector<1x128xf32>
    %11 = arith.mulf %7, %10 : vector<1x128xf32>
    %12 = arith.mulf %9, %9 : vector<1x128xf32>
    %13 = arith.subf %11, %12 : vector<1x128xf32>
    %c0_7 = arith.constant 0 : index
    %c0_8 = arith.constant 0 : index
    %14 = vector.load %arg4[%c0_7, %c0_8] : memref<1x128xf32, #tpu.memory_space<vmem>>, vector<1x128xf32>
    %cst_9 = arith.constant 9.99999974E-6 : f32
    %15 = vector.broadcast %cst_9 : f32 to vector<1x128xf32>
    %16 = arith.addf %13, %15 : vector<1x128xf32>
    %17 = math.rsqrt %16 : vector<1x128xf32>
    %18 = arith.mulf %14, %17 : vector<1x128xf32>
    %c0_10 = arith.constant 0 : index
    %c0_11 = arith.constant 0 : index
    %19 = vector.load %arg5[%c0_10, %c0_11] : memref<1x128xf32, #tpu.memory_space<vmem>>, vector<1x128xf32>
    %20 = arith.mulf %9, %18 : vector<1x128xf32>
    %21 = arith.subf %19, %20 : vector<1x128xf32>
    %22 = vector.broadcast %18 : vector<1x128xf32> to vector<512x128xf32>
    %23 = arith.mulf %2, %22 : vector<512x128xf32>
    %24 = vector.broadcast %21 : vector<1x128xf32> to vector<512x128xf32>
    %25 = arith.addf %23, %24 : vector<512x128xf32>
    %cst_12 = arith.constant 0.000000e+00 : f32
    %26 = vector.broadcast %cst_12 : f32 to vector<512x128xf32>
    %27 = arith.maximumf %25, %26 : vector<512x128xf32>
    %c0_13 = arith.constant 0 : index
    %c0_14 = arith.constant 0 : index
    %28 = vector.load %arg6[%c0_13, %c0_14] : memref<512x128xf32, #tpu.memory_space<vmem>>, vector<512x128xf32>
    tpu.vector_store %arg6[%c0_13, %c0_14], %27 {strides = array<i32>} : memref<512x128xf32, #tpu.memory_space<vmem>>, vector<512x128xf32>,
    return
  }
  func.func @transform_0(%arg0: i32) -> (i32, i32) {
    %c0_i32 = arith.constant 0 : i32
    %c0_i32_0 = arith.constant 0 : i32
    %c0_i32_1 = arith.constant 0 : i32
    return %c0_i32, %c0_i32_0 : i32, i32
  }
  func.func @transform_1(%arg0: i32) -> (i32, i32) {
    %c0_i32 = arith.constant 0 : i32
    %c0_i32_0 = arith.constant 0 : i32
    return %c0_i32, %arg0 : i32, i32
  }
  func.func @transform_2(%arg0: i32) -> (i32, i32) {
    %c0_i32 = arith.constant 0 : i32
    %c0_i32_0 = arith.constant 0 : i32
    return %c0_i32, %arg0 : i32, i32
  }
  func.func @transform_3(%arg0: i32) -> (i32, i32) {
    %c0_i32 = arith.constant 0 : i32
    %c0_i32_0 = arith.constant 0 : i32
    return %c0_i32, %arg0 : i32, i32
  }
  func.func @transform_4(%arg0: i32) -> (i32, i32) {
    %c0_i32 = arith.constant 0 : i32
    %c0_i32_0 = arith.constant 0 : i32
    return %c0_i32, %arg0 : i32, i32
  }
  func.func @transform_5(%arg0: i32) -> (i32, i32) {
    %c0_i32 = arith.constant 0 : i32
    %c0_i32_0 = arith.constant 0 : i32
    return %c0_i32, %arg0 : i32, i32
  }
}

</mosaic_0001>

<bundles_post_ra>
// kernel: tpu_custom_call.1
= control target key start
LH: loop header
LB: loop body
LE: loop exit
PB: predicated region body
PF: predicated region fallthrough
CT: control target
= control target key end

     0   :  { %s2061_s0 = inlined_call_operand.vmem [shape: bf16[512,48], index: 0, kind: input, shape index: {}]   ;;  %s2062_s1 = inlined_call_operand.vmem [shape: bf16[48,128], index: 1, kind: input, shape index: {}]   ;;  %s2063_s2 = inlined_call_operand.vmem [shape: f32[1,128], index: 2, kind: input, shape index: {}]   ;;  %s2064_s3 = inlined_call_operand.vmem [shape: f32[1,128], index: 3, kind: input, shape index: {}]   ;;  %s2065_s4 = inlined_call_operand.vmem [shape: f32[1,128], index: 4, kind: input, shape index: {}]   ;;  %s2066_s5 = inlined_call_operand.hbm [shape: f32[512,128], index: 5, kind: output, shape index: {}]  }
   0x1   :  { %v1244_v0 = vld [vmem:[%s2062_s1 + $0x10] sm:$0xff]  ;;  %v1243_v1 = vld [vmem:[%s2062_s1 + $0x8] sm:$0xff] }
   0x2   :  { %372 = vmatpush.bf16.msra.mxu0 %v1244_v0  ;;  %1245 = vmatpush.bf16.msra.mxu1 %v1244_v0 }
   0x3   :  { %10 = vsyncpa [#allocation3], 0  ;;  %1246 = vmatpush.bf16.msra.mxu2 %v1244_v0  ;;  %1247 = vmatpush.bf16.msra.mxu3 %v1244_v0  ;;  %v1242_v2 = vld [vmem:[%s2062_s1] sm:$0xff]  ;;  %vm270_vm0 = vcmask 392192   ;;  %v1211_v5 = vld [vmem:[%s2061_s0 + $0x8] sm:$0xff]  ;;  %s1026_s12 = sshll.u32 %s2066_s5, 4  ;;  %s1027_s12 = int_to_ptr.hbm [resolvable:$true] %s1026_s12 }
   0x4   :  { %v1210_v3 = vld [vmem:[%s2061_s0] sm:$0xff]  ;;  %v1219_v6 = vld [vmem:[%s2061_s0 + $0x48] sm:$0xff]  ;;  %v1212_v8 = vld [vmem:[%s2061_s0 + $0x10] sm:$0xff]  ;;  %s1286_s13 = smov 128   ;;  %s1287_s14 = smov 8  }
   0x5   :  { %v1218_v4 = vld [vmem:[%s2061_s0 + $0x40] sm:$0xff]  ;;  %v1220_v9 = vld [vmem:[%s2061_s0 + $0x50] sm:$0xff]  ;;  %v1227_v10 = vld [vmem:[%s2061_s0 + $0x88] sm:$0xff] }
   0x6   :  { %373 = vmatpush.bf16.msra.mxu0 %v1243_v1  ;;  %1248 = vmatpush.bf16.msra.mxu1 %v1243_v1  ;;  %v1226_v7 = vld [vmem:[%s2061_s0 + $0x80] sm:$0xff]  ;;  %v1213_v11 = vld [vmem:[%s2061_s0 + $0x18] sm:$0xff]  ;;  %v1228_v13 = vld [vmem:[%s2061_s0 + $0x90] sm:$0xff] }
   0x7   :  { %1249 = vmatpush.bf16.msra.mxu2 %v1243_v1  ;;  %1250 = vmatpush.bf16.msra.mxu3 %v1243_v1  ;;  %v1221_v12 = vld [vmem:[%s2061_s0 + $0x58] sm:$0xff]  ;;  %v1234_v14 = vld [vmem:[%s2061_s0 + $0xc0] sm:$0xff]  ;;  %v1235_v18 = vld [vmem:[%s2061_s0 + $0xc8] sm:$0xff] }
   0x8   :  { %v1214_v15 = vld [vmem:[%s2061_s0 + $0x20] sm:$0xff]  ;;  %v1229_v17 = vld [vmem:[%s2061_s0 + $0x98] sm:$0xff]  ;;  %v1215_v19 = vld [vmem:[%s2061_s0 + $0x28] sm:$0xff] }
   0x9   :  { %v1222_v16 = vld [vmem:[%s2061_s0 + $0x60] sm:$0xff]  ;;  %v1223_v20 = vld [vmem:[%s2061_s0 + $0x68] sm:$0xff]  ;;  %v1236_v22 = vld [vmem:[%s2061_s0 + $0xd0] sm:$0xff] }
   0xa   :  { %374 = vmatpush.bf16.msra.mxu0 %v1242_v2  ;;  %1251 = vmatpush.bf16.msra.mxu1 %v1242_v2  ;;  %v1230_v21 = vld [vmem:[%s2061_s0 + $0xa0] sm:$0xff]  ;;  %v1216_v23 = vld [vmem:[%s2061_s0 + $0x30] sm:$0xff]  ;;  %v1231_v25 = vld [vmem:[%s2061_s0 + $0xa8] sm:$0xff] }
   0xb   :  { %1252 = vmatpush.bf16.msra.mxu2 %v1242_v2  ;;  %1253 = vmatpush.bf16.msra.mxu3 %v1242_v2  ;;  %v1224_v24 = vld [vmem:[%s2061_s0 + $0x70] sm:$0xff]  ;;  %v1237_v26 = vld [vmem:[%s2061_s0 + $0xd8] sm:$0xff]  ;;  %v1238_v30 = vld [vmem:[%s2061_s0 + $0xe0] sm:$0xff] }
   0xc   :  { %v1217_v27 = vld [vmem:[%s2061_s0 + $0x38] sm:$0xff]  ;;  %v1232_v29 = vld [vmem:[%s2061_s0 + $0xb0] sm:$0xff]  ;;  %v1239_v34 = vld [vmem:[%s2061_s0 + $0xe8] sm:$0xff] }
   0xd   :  { %1178 = vmatmul.msk.bf16.vlgmr.msra.gmra.mxu0 %vm270_vm0, %v1210_v3  ;;  %1186 = vmatmul.msk.bf16.vlgmr.msra.gmra.mxu1 %vm270_vm0, %v1218_v4  ;;  %v1225_v28 = vld [vmem:[%s2061_s0 + $0x78] sm:$0xff]  ;;  %v1240_v38 = vld [vmem:[%s2061_s0 + $0xf0] sm:$0xff] }
   0xe   :  { %1194 = vmatmul.msk.bf16.vlgmr.msra.gmra.mxu2 %vm270_vm0, %v1226_v7  ;;  %1202 = vmatmul.msk.bf16.vlgmr.msra.gmra.mxu3 %vm270_vm0, %v1234_v14  ;;  %v1233_v33 = vld [vmem:[%s2061_s0 + $0xb8] sm:$0xff] }
   0xf   :  { %v1241_v44 = vld [vmem:[%s2061_s0 + $0xf8] sm:$0xff] }
  0x1d   :  { %1179 = vmatmul.msk.bf16.gmra.mxu0 %vm270_vm0, %v1211_v5  ;;  %1187 = vmatmul.msk.bf16.gmra.mxu1 %vm270_vm0, %v1219_v6 }
  0x1e   :  { %1195 = vmatmul.msk.bf16.gmra.mxu2 %vm270_vm0, %v1227_v10  ;;  %1203 = vmatmul.msk.bf16.gmra.mxu3 %vm270_vm0, %v1235_v18 }
  0x2d   :  { %1180 = vmatmul.msk.bf16.gmra.mxu0 %vm270_vm0, %v1212_v8  ;;  %1188 = vmatmul.msk.bf16.gmra.mxu1 %vm270_vm0, %v1220_v9 }
  0x2e   :  { %1196 = vmatmul.msk.bf16.gmra.mxu2 %vm270_vm0, %v1228_v13  ;;  %1204 = vmatmul.msk.bf16.gmra.mxu3 %vm270_vm0, %v1236_v22 }
  0x3d   :  { %1181 = vmatmul.msk.bf16.gmra.mxu0 %vm270_vm0, %v1213_v11  ;;  %1189 = vmatmul.msk.bf16.gmra.mxu1 %vm270_vm0, %v1221_v12 }
  0x3e   :  { %1197 = vmatmul.msk.bf16.gmra.mxu2 %vm270_vm0, %v1229_v17  ;;  %1205 = vmatmul.msk.bf16.gmra.mxu3 %vm270_vm0, %v1237_v26 }
  0x4d   :  { %1182 = vmatmul.msk.bf16.gmra.mxu0 %vm270_vm0, %v1214_v15  ;;  %1190 = vmatmul.msk.bf16.gmra.mxu1 %vm270_vm0, %v1222_v16 }
  0x4e   :  { %1198 = vmatmul.msk.bf16.gmra.mxu2 %vm270_vm0, %v1230_v21  ;;  %1206 = vmatmul.msk.bf16.gmra.mxu3 %vm270_vm0, %v1238_v30 }
  0x5d   :  { %1183 = vmatmul.msk.bf16.gmra.mxu0 %vm270_vm0, %v1215_v19  ;;  %1191 = vmatmul.msk.bf16.gmra.mxu1 %vm270_vm0, %v1223_v20 }
  0x5e   :  { %1199 = vmatmul.msk.bf16.gmra.mxu2 %vm270_vm0, %v1231_v25  ;;  %1207 = vmatmul.msk.bf16.gmra.mxu3 %vm270_vm0, %v1239_v34 }
  0x6d   :  { %1184 = vmatmul.msk.bf16.gmra.mxu0 %vm270_vm0, %v1216_v23  ;;  %1192 = vmatmul.msk.bf16.gmra.mxu1 %vm270_vm0, %v1224_v24 }
  0x6e   :  { %1200 = vmatmul.msk.bf16.gmra.mxu2 %vm270_vm0, %v1232_v29  ;;  %1208 = vmatmul.msk.bf16.gmra.mxu3 %vm270_vm0, %v1240_v38 }
  0x7d   :  { %1185 = vmatmul.msk.bf16.gmra.mxu0 %vm270_vm0, %v1217_v27  ;;  %1193 = vmatmul.msk.bf16.gmra.mxu1 %vm270_vm0, %v1225_v28 }
  0x7e   :  { %1201 = vmatmul.msk.bf16.gmra.mxu2 %vm270_vm0, %v1233_v33  ;;  %1209 = vmatmul.msk.bf16.gmra.mxu3 %vm270_vm0, %v1241_v44 }
  0x8a   :  { %v1439_v31 = vpop.f32.mrf.mxu0  ;;  %v1441_v32 = vpop.f32.mrf.mxu1 }
  0x8b   :  { %2090 = vst [vmem:[#allocation5_spill] sm:$0xff] %v1441_v32  ;;  %v605_v4 = vmul.f32 %v1439_v31, %v1439_v31 }
  0x91   :  { %v1469_v43 = vpop.f32.mrf.mxu2  ;;  %v1495_v55 = vpop.f32.mrf.mxu3 }
  0x92   :  { %v1451_v35 = vpop.f32.mrf.mxu0  ;;  %v1453_v36 = vpop.f32.mrf.mxu1  ;;  %2094 = vst [vmem:[#allocation9_spill] sm:$0xff] %v1469_v43 }
  0x93   :  { %2091 = vst [vmem:[#allocation6_spill] sm:$0xff] %v1453_v36  ;;  %v606_v2 = vmul.f32 %v1451_v35, %v1451_v35  ;;  %v536_v5 = vadd.f32 %v1451_v35, %v1439_v31 }
  0x95   :  { %v669_v8 = vadd.f32 %v606_v2, %v605_v4 }
  0x99   :  { %v1479_v47 = vpop.f32.mrf.mxu2  ;;  %v1503_v59 = vpop.f32.mrf.mxu3 }
  0x9a   :  { %v1455_v37 = vpop.f32.mrf.mxu0  ;;  %v1460_v39 = vpop.f32.mrf.mxu1  ;;  %2096 = vst [vmem:[#allocation11_spill] sm:$0xff] %v1479_v47 }
  0x9b   :  { %2092 = vst [vmem:[#allocation7_spill] sm:$0xff] %v1460_v39  ;;  %v607_v6 = vmul.f32 %v1455_v37, %v1455_v37  ;;  %v537_v9 = vadd.f32 %v536_v5, %v1455_v37 }
  0x9d   :  { %v670_v12 = vadd.f32 %v669_v8, %v607_v6 }
  0xa1   :  { %v1485_v50 = vpop.f32.mrf.mxu2  ;;  %v1511_v63 = vpop.f32.mrf.mxu3 }
  0xa2   :  { %v1463_v40 = vpop.f32.mrf.mxu0  ;;  %v1465_v41 = vpop.f32.mrf.mxu1  ;;  %2098 = vst [vmem:[#allocation13_spill] sm:$0xff] %v1485_v50 }
  0xa3   :  { %2093 = vst [vmem:[#allocation8_spill] sm:$0xff] %v1465_v41  ;;  %v608_v10 = vmul.f32 %v1463_v40, %v1463_v40  ;;  %v538_v13 = vadd.f32 %v537_v9, %v1463_v40 }
  0xa5   :  { %v671_v15 = vadd.f32 %v670_v12, %v608_v10 }
  0xa9   :  { %v1491_v53 = vpop.f32.mrf.mxu2  ;;  %v1527_v7 = vpop.f32.mrf.mxu3 }
  0xaa   :  { %v1467_v42 = vpop.f32.mrf.mxu0  ;;  %v1477_v46 = vpop.f32.mrf.mxu1  ;;  %2100 = vst [vmem:[#allocation15_spill] sm:$0xff] %v1491_v53 }
  0xab   :  { %2095 = vst [vmem:[#allocation10_spill] sm:$0xff] %v1477_v46  ;;  %v609_v14 = vmul.f32 %v1467_v42, %v1467_v42  ;;  %v539_v16 = vadd.f32 %v538_v13, %v1467_v42 }
  0xad   :  { %v672_v19 = vadd.f32 %v671_v15, %v609_v14 }
  0xb1   :  { %v1501_v58 = vpop.f32.mrf.mxu2  ;;  %v1552_v27 = vpop.f32.mrf.mxu3 }
  0xb2   :  { %v1475_v45 = vpop.f32.mrf.mxu0  ;;  %v1483_v49 = vpop.f32.mrf.mxu1  ;;  %2102 = vst [vmem:[#allocation17_spill] sm:$0xff] %v1501_v58 }
  0xb3   :  { %2097 = vst [vmem:[#allocation12_spill] sm:$0xff] %v1483_v49  ;;  %v610_v17 = vmul.f32 %v1475_v45, %v1475_v45  ;;  %v540_v20 = vadd.f32 %v539_v16, %v1475_v45 }
  0xb5   :  { %v673_v23 = vadd.f32 %v672_v19, %v610_v17 }
  0xb9   :  { %v1509_v62 = vpop.f32.mrf.mxu2  ;;  %v1575_v16 = vpop.f32.mrf.mxu3 }
  0xba   :  { %v1481_v48 = vpop.f32.mrf.mxu0  ;;  %v1489_v52 = vpop.f32.mrf.mxu1 }
  0xbb   :  { %2099 = vst [vmem:[#allocation14_spill] sm:$0xff] %v1489_v52  ;;  %v611_v21 = vmul.f32 %v1481_v48, %v1481_v48  ;;  %v541_v24 = vadd.f32 %v540_v20, %v1481_v48 }
  0xbd   :  { %v674_v28 = vadd.f32 %v673_v23, %v611_v21 }
  0xc1   :  { %v1519_v3 = vpop.f32.mrf.mxu2 }
  0xc2   :  { %v1487_v51 = vpop.f32.mrf.mxu0  ;;  %v1497_v56 = vpop.f32.mrf.mxu1 }
  0xc3   :  { %2101 = vst [vmem:[#allocation16_spill] sm:$0xff] %v1497_v56  ;;  %v612_v25 = vmul.f32 %v1487_v51, %v1487_v51  ;;  %v542_v29 = vadd.f32 %v541_v24, %v1487_v51 }
  0xc5   :  { %v675_v33 = vadd.f32 %v674_v28, %v612_v25 }
  0xc9   :  { %v1545_v22 = vpop.f32.mrf.mxu2 }
  0xca   :  { %v1493_v54 = vpop.f32.mrf.mxu0  ;;  %v1507_v61 = vpop.f32.mrf.mxu1 }
  0xcb   :  { %2103 = vst [vmem:[#allocation18_spill] sm:$0xff] %v1507_v61  ;;  %v613_v30 = vmul.f32 %v1493_v54, %v1493_v54  ;;  %v543_v34 = vadd.f32 %v542_v29, %v1493_v54 }
  0xcd   :  { %v676_v44 = vadd.f32 %v675_v33, %v613_v30 }
  0xd1   :  { %v1570_v12 = vpop.f32.mrf.mxu2 }
  0xd2   :  { %v1499_v57 = vpop.f32.mrf.mxu0  ;;  %v1515_v1 = vpop.f32.mrf.mxu1 }
  0xd3   :  { %2104 = vst [vmem:[#allocation19_spill] sm:$0xff] %v1515_v1  ;;  %v614_v38 = vmul.f32 %v1499_v57, %v1499_v57  ;;  %v544_v2 = vadd.f32 %v543_v34, %v1499_v57 }
  0xd5   :  { %v677_v6 = vadd.f32 %v676_v44, %v614_v38 }
  0xd9   :  { %v1591_v44 = vpop.f32.mrf.mxu2 }
  0xda   :  { %v1505_v60 = vpop.f32.mrf.mxu0  ;;  %v1540_v18 = vpop.f32.mrf.mxu1 }
  0xdb   :  { %2105 = vst [vmem:[#allocation20_spill] sm:$0xff] %v1540_v18  ;;  %v615_v4 = vmul.f32 %v1505_v60, %v1505_v60  ;;  %v545_v8 = vadd.f32 %v544_v2, %v1505_v60  ;;  %v621_v2 = vmul.f32 %v1441_v32, %v1441_v32 }
  0xdd   :  { %v678_v13 = vadd.f32 %v677_v6, %v615_v4 }
  0xe2   :  { %v1513_v0 = vpop.f32.mrf.mxu0  ;;  %v1563_v5 = vpop.f32.mrf.mxu1 }
  0xe3   :  { %2106 = vst [vmem:[#allocation21_spill] sm:$0xff] %v1563_v5  ;;  %v616_v9 = vmul.f32 %v1513_v0, %v1513_v0  ;;  %v546_v14 = vadd.f32 %v545_v8, %v1513_v0  ;;  %v1596_v8 = vpop.f32.mrf.mxu3 }
  0xe5   :  { %v679_v17 = vadd.f32 %v678_v13, %v616_v9  ;;  %v622_v9 = vmul.f32 %v1453_v36, %v1453_v36 }
  0xea   :  { %v1532_v11 = vpop.f32.mrf.mxu0  ;;  %v1586_v30 = vpop.f32.mrf.mxu1 }
  0xeb   :  { %v617_v15 = vmul.f32 %v1532_v11, %v1532_v11  ;;  %v547_v19 = vadd.f32 %v546_v14, %v1532_v11  ;;  %2109 = vst [vmem:[#allocation24_spill] sm:$0xff] %v1586_v30 }
  0xed   :  { %v680_v21 = vadd.f32 %v679_v17, %v617_v15  ;;  %v623_v15 = vmul.f32 %v1460_v39, %v1460_v39 }
  0xf2   :  { %v1550_v26 = vpop.f32.mrf.mxu0 }
  0xf3   :  { %v618_v20 = vmul.f32 %v1550_v26, %v1550_v26  ;;  %v548_v23 = vadd.f32 %v547_v19, %v1550_v26 }
  0xf5   :  { %v681_v25 = vadd.f32 %v680_v21, %v618_v20  ;;  %v624_v20 = vmul.f32 %v1465_v41, %v1465_v41 }
  0xfa   :  { %v1568_v10 = vpop.f32.mrf.mxu0 }
  0xfb   :  { %2107 = vst [vmem:[#allocation22_spill] sm:$0xff] %v1568_v10  ;;  %v619_v24 = vmul.f32 %v1568_v10, %v1568_v10  ;;  %v549_v28 = vadd.f32 %v548_v23, %v1568_v10 }
  0xfd   :  { %v682_v33 = vadd.f32 %v681_v25, %v619_v24  ;;  %v1607_v24 = vpop.f32.mrf.mxu1  ;;  %v625_v25 = vmul.f32 %v1477_v46, %v1477_v46 }
  0xfe   :  { %2110 = vst [vmem:[#allocation25_spill] sm:$0xff] %v1607_v24 }
 0x102   :  { %v1584_v29 = vpop.f32.mrf.mxu0 }
 0x103   :  { %2108 = vst [vmem:[#allocation23_spill] sm:$0xff] %v1584_v29  ;;  %v550_v34 = vadd.f32 %v549_v28, %v1584_v29  ;;  %v620_v38 = vmul.f32 %v1584_v29, %v1584_v29 }
 0x105   :  { %v551_v4 = vadd.f32 %v550_v34, %v1441_v32  ;;  %v683_v6 = vadd.f32 %v682_v33, %v620_v38  ;;  %v1612_v34 = vpop.f32.mrf.mxu2  ;;  %v626_v38 = vmul.f32 %v1483_v49, %v1483_v49 }
 0x107   :  { %v552_v13 = vadd.f32 %v551_v4, %v1453_v36  ;;  %v684_v14 = vadd.f32 %v683_v6, %v621_v2  ;;  %v1617_v6 = vpop.f32.mrf.mxu3 }
 0x109   :  { %v553_v17 = vadd.f32 %v552_v13, %v1460_v39  ;;  %v685_v19 = vadd.f32 %v684_v14, %v622_v9  ;;  %v627_v9 = vmul.f32 %v1489_v52, %v1489_v52 }
 0x10b   :  { %v554_v21 = vadd.f32 %v553_v17, %v1465_v41  ;;  %v686_v23 = vadd.f32 %v685_v19, %v623_v15  ;;  %v628_v15 = vmul.f32 %v1497_v56, %v1497_v56 }
 0x10d   :  { %v555_v28 = vadd.f32 %v554_v21, %v1477_v46  ;;  %v687_v33 = vadd.f32 %v686_v23, %v624_v20  ;;  %v629_v20 = vmul.f32 %v1507_v61, %v1507_v61 }
 0x10f   :  { %v556_v2 = vadd.f32 %v555_v28, %v1483_v49  ;;  %v688_v4 = vadd.f32 %v687_v33, %v625_v25  ;;  %v1628_v25 = vpop.f32.mrf.mxu1  ;;  %v630_v28 = vmul.f32 %v1515_v1, %v1515_v1 }
 0x110   :  { %2111 = vst [vmem:[#allocation26_spill] sm:$0xff] %v1628_v25 }
 0x111   :  { %v689_v13 = vadd.f32 %v688_v4, %v626_v38  ;;  %v557_v14 = vadd.f32 %v556_v2, %v1489_v52  ;;  %v1633_v2 = vpop.f32.mrf.mxu2  ;;  %v631_v4 = vmul.f32 %v1540_v18, %v1540_v18 }
 0x113   :  { %v558_v17 = vadd.f32 %v557_v14, %v1497_v56  ;;  %v690_v19 = vadd.f32 %v689_v13, %v627_v9  ;;  %v1638_v14 = vpop.f32.mrf.mxu3 }
 0x115   :  { %v559_v21 = vadd.f32 %v558_v17, %v1507_v61  ;;  %v691_v23 = vadd.f32 %v690_v19, %v628_v15  ;;  %v632_v15 = vmul.f32 %v1563_v5, %v1563_v5 }
 0x117   :  { %v560_v33 = vadd.f32 %v559_v21, %v1515_v1  ;;  %v692_v38 = vadd.f32 %v691_v23, %v629_v20  ;;  %v633_v20 = vmul.f32 %v1586_v30, %v1586_v30 }
 0x119   :  { %v561_v9 = vadd.f32 %v560_v33, %v1540_v18  ;;  %v693_v13 = vadd.f32 %v692_v38, %v630_v28  ;;  %v634_v28 = vmul.f32 %v1607_v24, %v1607_v24  ;;  %v1649_v33 = vpop.f32.mrf.mxu1 }
 0x11a   :  { %2112 = vst [vmem:[#allocation27_spill] sm:$0xff] %v1649_v33 }
 0x11b   :  { %v562_v17 = vadd.f32 %v561_v9, %v1563_v5  ;;  %v694_v19 = vadd.f32 %v693_v13, %v631_v4  ;;  %v635_v4 = vmul.f32 %v1628_v25, %v1628_v25  ;;  %v1654_v9 = vpop.f32.mrf.mxu2 }
 0x11d   :  { %v563_v61 = vadd.f32 %v562_v17, %v1586_v30  ;;  %v695_v21 = vadd.f32 %v694_v19, %v632_v15  ;;  %v636_v15 = vmul.f32 %v1649_v33, %v1649_v33  ;;  %v637_v19 = vmul.f32 %v1469_v43, %v1469_v43 }
 0x11f   :  { %v696_v23 = vadd.f32 %v695_v21, %v633_v20  ;;  %v564_v1 = vadd.f32 %v563_v61, %v1607_v24  ;;  %v1659_v61 = vpop.f32.mrf.mxu3 }
 0x121   :  { %v697_v38 = vadd.f32 %v696_v23, %v634_v28  ;;  %v565_v18 = vadd.f32 %v564_v1, %v1628_v25  ;;  %v638_v1 = vmul.f32 %v1479_v47, %v1479_v47 }
 0x123   :  { %v698_v13 = vadd.f32 %v697_v38, %v635_v4  ;;  %v566_v17 = vadd.f32 %v565_v18, %v1649_v33  ;;  %v639_v18 = vmul.f32 %v1485_v50, %v1485_v50  ;;  %v640_v33 = vmul.f32 %v1491_v53, %v1491_v53 }
 0x125   :  { %v567_v20 = vadd.f32 %v566_v17, %v1469_v43  ;;  %v699_v21 = vadd.f32 %v698_v13, %v636_v15  ;;  %v1673_v17 = vpop.f32.mrf.mxu2  ;;  %v641_v13 = vmul.f32 %v1501_v58, %v1501_v58 }
 0x127   :  { %v568_v23 = vadd.f32 %v567_v20, %v1479_v47  ;;  %v700_v28 = vadd.f32 %v699_v21, %v637_v19  ;;  %v1678_v20 = vpop.f32.mrf.mxu3  ;;  %v642_v21 = vmul.f32 %v1509_v62, %v1509_v62  ;;  %v650_v47 = vmul.f32 %v1673_v17, %v1673_v17 }
 0x129   :  { %v569_v38 = vadd.f32 %v568_v23, %v1485_v50  ;;  %v701_v4 = vadd.f32 %v700_v28, %v638_v1  ;;  %v643_v28 = vmul.f32 %v1519_v3, %v1519_v3 }
 0x12b   :  { %v570_v25 = vadd.f32 %v569_v38, %v1491_v53  ;;  %v702_v24 = vadd.f32 %v701_v4, %v639_v18  ;;  %v644_v4 = vmul.f32 %v1545_v22, %v1545_v22 }
 0x12d   :  { %v571_v15 = vadd.f32 %v570_v25, %v1501_v58  ;;  %v703_v19 = vadd.f32 %v702_v24, %v640_v33  ;;  %v645_v33 = vmul.f32 %v1570_v12, %v1570_v12 }
 0x12f   :  { %v572_v1 = vadd.f32 %v571_v15, %v1509_v62  ;;  %v704_v23 = vadd.f32 %v703_v19, %v641_v13  ;;  %v1692_v15 = vpop.f32.mrf.mxu2  ;;  %v646_v13 = vmul.f32 %v1591_v44, %v1591_v44 }
 0x131   :  { %v705_v18 = vadd.f32 %v704_v23, %v642_v21  ;;  %v573_v38 = vadd.f32 %v572_v1, %v1519_v3  ;;  %v1697_v1 = vpop.f32.mrf.mxu3  ;;  %v647_v23 = vmul.f32 %v1612_v34, %v1612_v34 }
 0x133   :  { %v574_v25 = vadd.f32 %v573_v38, %v1545_v22  ;;  %v706_v24 = vadd.f32 %v705_v18, %v643_v28 }
 0x135   :  { %v575_v58 = vadd.f32 %v574_v25, %v1570_v12  ;;  %v707_v53 = vadd.f32 %v706_v24, %v644_v4  ;;  %v648_v4 = vmul.f32 %v1633_v2, %v1633_v2 }
 0x137   :  { %v576_v19 = vadd.f32 %v575_v58, %v1591_v44  ;;  %v708_v21 = vadd.f32 %v707_v53, %v645_v33  ;;  %v649_v53 = vmul.f32 %v1654_v9, %v1654_v9 }
 0x139   :  { %v577_v28 = vadd.f32 %v576_v19, %v1612_v34  ;;  %v709_v18 = vadd.f32 %v708_v21, %v646_v13  ;;  %v1711_v19 = vpop.f32.mrf.mxu2 }
 0x13b   :  { %v578_v38 = vadd.f32 %v577_v28, %v1633_v2  ;;  %v710_v25 = vadd.f32 %v709_v18, %v647_v23  ;;  %v651_v23 = vmul.f32 %v1692_v15, %v1692_v15  ;;  %v1716_v28 = vpop.f32.mrf.mxu3 }
 0x13c   :  { %v665_v56 = vmul.f32 %v1716_v28, %v1716_v28 }
 0x13d   :  { %v711_v24 = vadd.f32 %v710_v25, %v648_v4  ;;  %v579_v50 = vadd.f32 %v578_v38, %v1654_v9  ;;  %v652_v4 = vmul.f32 %v1711_v19, %v1711_v19 }
 0x13f   :  { %v712_v58 = vadd.f32 %v711_v24, %v649_v53  ;;  %v580_v33 = vadd.f32 %v579_v50, %v1673_v17  ;;  %v653_v50 = vmul.f32 %v1495_v55, %v1495_v55 }
 0x141   :  { %v713_v13 = vadd.f32 %v712_v58, %v650_v47  ;;  %v581_v21 = vadd.f32 %v580_v33, %v1692_v15  ;;  %v654_v47 = vmul.f32 %v1503_v59, %v1503_v59  ;;  %v655_v33 = vmul.f32 %v1511_v63, %v1511_v63 }
 0x143   :  { %v714_v18 = vadd.f32 %v713_v13, %v651_v23  ;;  %v582_v38 = vadd.f32 %v581_v21, %v1711_v19  ;;  %v656_v23 = vmul.f32 %v1527_v7, %v1527_v7 }
 0x145   :  { %v583_v25 = vadd.f32 %v582_v38, %v1495_v55  ;;  %v715_v24 = vadd.f32 %v714_v18, %v652_v4  ;;  %v1733_v38 = vpop.f32.mrf.mxu3  ;;  %v657_v18 = vmul.f32 %v1552_v27, %v1552_v27 }
 0x147   :  { %v584_v53 = vadd.f32 %v583_v25, %v1503_v59  ;;  %v716_v58 = vadd.f32 %v715_v24, %v653_v50  ;;  %v658_v25 = vmul.f32 %v1575_v16, %v1575_v16 }
 0x149   :  { %v585_v13 = vadd.f32 %v584_v53, %v1511_v63  ;;  %v717_v21 = vadd.f32 %v716_v58, %v654_v47  ;;  %v659_v53 = vmul.f32 %v1596_v8, %v1596_v8 }
 0x14b   :  { %v586_v43 = vadd.f32 %v585_v13, %v1527_v7  ;;  %v718_v30 = vadd.f32 %v717_v21, %v655_v33  ;;  %v660_v13 = vmul.f32 %v1617_v6, %v1617_v6 }
 0x14d   :  { %v587_v4 = vadd.f32 %v586_v43, %v1552_v27  ;;  %v719_v50 = vadd.f32 %v718_v30, %v656_v23  ;;  %v661_v43 = vmul.f32 %v1638_v14, %v1638_v14 }
 0x14f   :  { %v588_v24 = vadd.f32 %v587_v4, %v1575_v16  ;;  %v720_v47 = vadd.f32 %v719_v50, %v657_v18  ;;  %v1750_v4 = vpop.f32.mrf.mxu3  ;;  %v662_v18 = vmul.f32 %v1659_v61, %v1659_v61 }
 0x151   :  { %v721_v58 = vadd.f32 %v720_v47, %v658_v25  ;;  %v589_v33 = vadd.f32 %v588_v24, %v1596_v8  ;;  %v663_v24 = vmul.f32 %v1678_v20, %v1678_v20 }
 0x153   :  { %v590_v21 = vadd.f32 %v589_v33, %v1617_v6  ;;  %v722_v5 = vadd.f32 %v721_v58, %v659_v53  ;;  %v664_v33 = vmul.f32 %v1697_v1, %v1697_v1 }
 0x155   :  { %v591_v30 = vadd.f32 %v590_v21, %v1638_v14  ;;  %v723_v23 = vadd.f32 %v722_v5, %v660_v13 }
 0x157   :  { %v592_v50 = vadd.f32 %v591_v30, %v1659_v61  ;;  %v724_v25 = vadd.f32 %v723_v23, %v661_v43  ;;  %v666_v23 = vmul.f32 %v1733_v38, %v1733_v38 }
 0x159   :  { %v593_v47 = vadd.f32 %v592_v50, %v1678_v20  ;;  %v725_v53 = vadd.f32 %v724_v25, %v662_v18  ;;  %v533_v50 = vpop.f32.mrf.mxu3 }
 0x15b   :  { %v594_v58 = vadd.f32 %v593_v47, %v1697_v1  ;;  %v726_v5 = vadd.f32 %v725_v53, %v663_v24  ;;  %v667_v47 = vmul.f32 %v1750_v4, %v1750_v4 }
 0x15d   :  { %v727_v13 = vadd.f32 %v726_v5, %v664_v33  ;;  %v595_v21 = vadd.f32 %v594_v58, %v1716_v28  ;;  %v668_v33 = vmul.f32 %v533_v50, %v533_v50 }
 0x15f   :  { %v728_v30 = vadd.f32 %v727_v13, %v665_v56  ;;  %v596_v43 = vadd.f32 %v595_v21, %v1733_v38 }
 0x161   :  { %v729_v18 = vadd.f32 %v728_v30, %v666_v23  ;;  %v597_v25 = vadd.f32 %v596_v43, %v1750_v4 }
 0x163   :  { %v730_v24 = vadd.f32 %v729_v18, %v667_v47  ;;  %v598_v53 = vadd.f32 %v597_v25, %v533_v50 }
 0x165   :  { %v599_v58 = vrot.slane %v598_v53, 4  ;;  %v731_v5 = vadd.f32 %v730_v24, %v668_v33 }
 0x167   :  { %v600_v52 = vadd.f32 %v599_v58, %v598_v53  ;;  %v732_v49 = vrot.slane %v731_v5, 4 }
 0x169   :  { %v601_v56 = vrot.slane %v600_v52, 2  ;;  %v733_v13 = vadd.f32 %v732_v49, %v731_v5  ;;  %v742_v49 = vld [vmem:[%s2064_s3] sm:$0x1]  ;;  %s1285_s3 = smov [#allocation2]  }
 0x16b   :  { %v602_v21 = vadd.f32 %v601_v56, %v600_v52  ;;  %v734_v46 = vrot.slane %v733_v13, 2 }
 0x16d   :  { %v603_v41 = vrot.slane %v602_v21, 1  ;;  %v735_v39 = vadd.f32 %v734_v46, %v733_v13 }
 0x16f   :  { %v604_v36 = vadd.f32 %v603_v41, %v602_v21  ;;  %v736_v30 = vrot.slane %v735_v39, 1 }
 0x171   :  { %v737_v23 = vadd.f32 %v736_v30, %v735_v39  ;;  %v738_v43 = vmul.f32 0.001953125, %v604_v36 }
 0x173   :  { %v739_v32 = vmul.f32 0.001953125, %v737_v23  ;;  %v740_v29 = vmul.f32 %v738_v43, %v738_v43 }
 0x175   :  { %v741_v10 = vsub.f32 %v739_v32, %v740_v29  ;;  %v755_v32 = vld [vmem:[%s2065_s4] sm:$0x1]  ;;  %s1024_s4 = sshll.u32 %s1285_s3, 4  ;;  %s1025_s4 = int_to_ptr.vmem [resolvable:$true] %s1024_s4 }
 0x177   :  { %v743_v18 = vadd.f32 1e-05, %v741_v10 }
 0x179   :  { %1257 = vrsqrt.f32 %v743_v18  ;;  %vm750_vm2 = vweird.f32 %v743_v18 }
 0x17f   :  { %v1258_v25 = vpop.eup %1257 }
 0x180   :  { %v745_v47 = vmul.f32 %v1258_v25, %v743_v18  ;;  %vm751_vm1 = vweird.f32 %v1258_v25 }
 0x181   :  { %vm752_vm3 = vmor %vm750_vm2, %vm751_vm1 }
 0x182   :  { %v746_v24 = vmul.f32 %v1258_v25, %v745_v47 }
 0x184   :  { %v747_v53 = vmul.f32 0.5, %v746_v24 }
 0x186   :  { %v748_v33 = vsub.f32 1.5, %v747_v53 }
 0x188   :  { %v749_v46 = vmul.f32 %v1258_v25, %v748_v33 }
 0x18a   :  { %v753_v39 = vsel %vm752_vm3, %v1258_v25, %v749_v46 }
 0x18b   :  { %v754_v36 = vmul.f32 %v753_v39, %v742_v49 }
 0x18d   :  { %v756_v41 = vmul.f32 %v754_v36, %v738_v43  ;;  %v1776_v52 = vperm.slane %v754_v36, 0 }
 0x18f   :  { %v757_v10 = vsub.f32 %v755_v32, %v756_v41  ;;  %v824_v29 = vmul.f32 %v1776_v52, %v533_v50  ;;  %v761_v13 = vmul.f32 %v1776_v52, %v1439_v31  ;;  %v762_v21 = vmul.f32 %v1776_v52, %v1451_v35 }
 0x190   :  { %v763_v30 = vmul.f32 %v1776_v52, %v1455_v37  ;;  %v764_v23 = vmul.f32 %v1776_v52, %v1463_v40  ;;  %v765_v50 = vmul.f32 %v1776_v52, %v1467_v42  ;;  %v766_v43 = vmul.f32 %v1776_v52, %v1475_v45 }
 0x191   :  { %v1779_v58 = vperm.slane %v757_v10, 0  ;;  %v767_v18 = vmul.f32 %v1776_v52, %v1481_v48  ;;  %v1798_v31 = vmul.f32 %v1776_v52, %v1487_v51  ;;  %v1802_v35 = vmul.f32 %v1776_v52, %v1493_v54 }
 0x192   :  { %v1806_v37 = vmul.f32 %v1776_v52, %v1499_v57  ;;  %v798_v40 = vmul.f32 %v1776_v52, %v1509_v62  ;;  %v799_v42 = vmul.f32 %v1776_v52, %v1519_v3  ;;  %v800_v45 = vmul.f32 %v1776_v52, %v1545_v22 }
 0x193   :  { %v891_v5 = vadd.f32 %v1779_v58, %v824_v29  ;;  %v801_v48 = vmul.f32 %v1776_v52, %v1570_v12  ;;  %v802_v51 = vmul.f32 %v1776_v52, %v1591_v44  ;;  %v803_v54 = vmul.f32 %v1776_v52, %v1612_v34 }
 0x194   :  { %v804_v57 = vmul.f32 %v1776_v52, %v1633_v2  ;;  %v805_v62 = vmul.f32 %v1776_v52, %v1654_v9  ;;  %v806_v3 = vmul.f32 %v1776_v52, %v1673_v17  ;;  %v807_v22 = vmul.f32 %v1776_v52, %v1692_v15 }
 0x195   :  { %v955_v56 = vmax.f32 %v891_v5, 0.0  ;;  %v808_v12 = vmul.f32 %v1776_v52, %v1711_v19  ;;  %v809_v44 = vmul.f32 %v1776_v52, %v1495_v55  ;;  %v810_v34 = vmul.f32 %v1776_v52, %v1503_v59 }
 0x196   :  { %v811_v2 = vmul.f32 %v1776_v52, %v1511_v63  ;;  %v812_v9 = vmul.f32 %v1776_v52, %v1527_v7  ;;  %v813_v17 = vmul.f32 %v1776_v52, %v1552_v27  ;;  %v814_v15 = vmul.f32 %v1776_v52, %v1575_v16 }
 0x197   :  { %1019 = vst [vmem:[#allocation2 + $0x1f8] sm:$0xff] %v955_v56  ;;  %v815_v19 = vmul.f32 %v1776_v52, %v1596_v8  ;;  %v816_v55 = vmul.f32 %v1776_v52, %v1617_v6  ;;  %v817_v59 = vmul.f32 %v1776_v52, %v1638_v14  ;;  %v818_v63 = vmul.f32 %v1776_v52, %v1659_v61 }
 0x198   :  { %v819_v7 = vmul.f32 %v1776_v52, %v1678_v20  ;;  %v820_v27 = vmul.f32 %v1776_v52, %v1697_v1  ;;  %v821_v16 = vmul.f32 %v1776_v52, %v1716_v28  ;;  %v822_v8 = vmul.f32 %v1776_v52, %v1733_v38 }
 0x199   :  { %v823_v6 = vmul.f32 %v1776_v52, %v1750_v4  ;;  %v828_v14 = vadd.f32 %v1779_v58, %v761_v13  ;;  %v829_v25 = vadd.f32 %v1779_v58, %v762_v21  ;;  %v830_v61 = vadd.f32 %v1779_v58, %v763_v30 }
 0x19a   :  { %v831_v20 = vadd.f32 %v1779_v58, %v764_v23  ;;  %v832_v47 = vadd.f32 %v1779_v58, %v765_v50  ;;  %v833_v1 = vadd.f32 %v1779_v58, %v766_v43  ;;  %v834_v28 = vadd.f32 %v1779_v58, %v767_v18 }
 0x19b   :  { %v1868_v24 = vadd.f32 %v1779_v58, %v798_v40  ;;  %v1871_v38 = vadd.f32 %v1779_v58, %v799_v42  ;;  %v1874_v4 = vadd.f32 %v1779_v58, %v800_v45  ;;  %v1877_v53 = vadd.f32 %v1779_v58, %v801_v48 }
 0x19c   :  { %v1880_v33 = vadd.f32 %v1779_v58, %v802_v51  ;;  %v1883_v49 = vadd.f32 %v1779_v58, %v803_v54  ;;  %v1886_v46 = vadd.f32 %v1779_v58, %v804_v57  ;;  %v1889_v39 = vadd.f32 %v1779_v58, %v805_v62 }
 0x19d   :  { %v1892_v36 = vadd.f32 %v1779_v58, %v806_v3  ;;  %v1895_v32 = vadd.f32 %v1779_v58, %v807_v22  ;;  %v1898_v41 = vadd.f32 %v1779_v58, %v808_v12  ;;  %v1901_v10 = vadd.f32 %v1779_v58, %v809_v44 }
 0x19e   :  { %v1904_v29 = vadd.f32 %v1779_v58, %v810_v34  ;;  %v1907_v5 = vadd.f32 %v1779_v58, %v811_v2  ;;  %v1910_v56 = vadd.f32 %v1779_v58, %v812_v9  ;;  %v1913_v13 = vadd.f32 %v1779_v58, %v813_v17 }
 0x19f   :  { %v1916_v21 = vadd.f32 %v1779_v58, %v814_v15  ;;  %v1919_v30 = vadd.f32 %v1779_v58, %v815_v19  ;;  %v1922_v23 = vadd.f32 %v1779_v58, %v816_v55  ;;  %v1925_v50 = vadd.f32 %v1779_v58, %v817_v59 }
 0x1a0   :  { %v1928_v43 = vadd.f32 %v1779_v58, %v818_v63  ;;  %v1931_v18 = vadd.f32 %v1779_v58, %v819_v7  ;;  %v1934_v40 = vadd.f32 %v1779_v58, %v820_v27  ;;  %v1937_v42 = vadd.f32 %v1779_v58, %v821_v16  ;;  %v2114_v63 = vld [vmem:[#allocation23_spill] sm:$0xff]  ;;  %v2115_v16 = vld [vmem:[#allocation5_spill] sm:$0xff] }
 0x1a1   :  { %v1940_v45 = vadd.f32 %v1779_v58, %v822_v8  ;;  %v1943_v48 = vadd.f32 %v1779_v58, %v823_v6  ;;  %v892_v51 = vmax.f32 %v828_v14, 0.0  ;;  %v835_v54 = vadd.f32 %v1779_v58, %v1798_v31  ;;  %v2116_v14 = vld [vmem:[#allocation6_spill] sm:$0xff] }
 0x1a2   :  { %v893_v57 = vmax.f32 %v829_v25, 0.0  ;;  %v894_v62 = vmax.f32 %v830_v61, 0.0  ;;  %v895_v3 = vmax.f32 %v831_v20, 0.0  ;;  %v771_v22 = vmul.f32 %v1776_v52, %v1505_v60 }
 0x1a3   :  { %v836_v12 = vadd.f32 %v1779_v58, %v1802_v35  ;;  %v896_v44 = vmax.f32 %v832_v47, 0.0  ;;  %956 = vst [vmem:[#allocation2] sm:$0xff] %v892_v51  ;;  %v772_v34 = vmul.f32 %v1776_v52, %v1513_v0  ;;  %v837_v2 = vadd.f32 %v1779_v58, %v1806_v37  ;;  %v2113_v0 = vld [vmem:[#allocation22_spill] sm:$0xff]  ;;  %v2117_v47 = vld [vmem:[#allocation7_spill] sm:$0xff] }
 0x1a4   :  { %v897_v9 = vmax.f32 %v833_v1, 0.0  ;;  %957 = vst [vmem:[#allocation2 + $0x8] sm:$0xff] %v893_v57  ;;  %v773_v31 = vmul.f32 %v1776_v52, %v1532_v11  ;;  %v838_v17 = vadd.f32 %v1779_v58, %v771_v22  ;;  %v898_v15 = vmax.f32 %v834_v28, 0.0  ;;  %v2119_v22 = vld [vmem:[#allocation10_spill] sm:$0xff] }
 0x1a5   :  { %958 = vst [vmem:[#allocation2 + $0x10] sm:$0xff] %v894_v62  ;;  %v774_v60 = vmul.f32 %v1776_v52, %v1550_v26  ;;  %v839_v35 = vadd.f32 %v1779_v58, %v772_v34  ;;  %v899_v19 = vmax.f32 %v835_v54, 0.0  ;;  %v775_v55 = vmul.f32 %v1776_v52, %v2113_v0  ;;  %v2118_v54 = vld [vmem:[#allocation8_spill] sm:$0xff] }
 0x1a6   :  { %959 = vst [vmem:[#allocation2 + $0x18] sm:$0xff] %v895_v3  ;;  %v840_v37 = vadd.f32 %v1779_v58, %v773_v31  ;;  %v900_v59 = vmax.f32 %v836_v12, 0.0  ;;  %v776_v11 = vmul.f32 %v1776_v52, %v2114_v63  ;;  %v901_v27 = vmax.f32 %v837_v2, 0.0  ;;  %v2120_v2 = vld [vmem:[#allocation12_spill] sm:$0xff]  ;;  %v2123_v63 = vld [vmem:[#allocation18_spill] sm:$0xff] }
 0x1a7   :  { %960 = vst [vmem:[#allocation2 + $0x20] sm:$0xff] %v896_v44  ;;  %v841_v7 = vadd.f32 %v1779_v58, %v774_v60  ;;  %v777_v26 = vmul.f32 %v1776_v52, %v2115_v16  ;;  %v842_v8 = vadd.f32 %v1779_v58, %v775_v55  ;;  %v902_v6 = vmax.f32 %v838_v17, 0.0  ;;  %v2122_v0 = vld [vmem:[#allocation16_spill] sm:$0xff]  ;;  %v2124_v16 = vld [vmem:[#allocation19_spill] sm:$0xff] }
 0x1a8   :  { %961 = vst [vmem:[#allocation2 + $0x28] sm:$0xff] %v897_v9  ;;  %v778_v25 = vmul.f32 %v1776_v52, %v2116_v14  ;;  %v843_v61 = vadd.f32 %v1779_v58, %v776_v11  ;;  %v903_v20 = vmax.f32 %v839_v35, 0.0  ;;  %v779_v1 = vmul.f32 %v1776_v52, %v2117_v47  ;;  %v2125_v14 = vld [vmem:[#allocation20_spill] sm:$0xff]  ;;  %v2126_v47 = vld [vmem:[#allocation21_spill] sm:$0xff] }
 0x1a9   :  { %962 = vst [vmem:[#allocation2 + $0x30] sm:$0xff] %v898_v15  ;;  %v844_v28 = vadd.f32 %v1779_v58, %v777_v26  ;;  %v904_v51 = vmax.f32 %v840_v37, 0.0  ;;  %v780_v57 = vmul.f32 %v1776_v52, %v2118_v54  ;;  %v905_v3 = vmax.f32 %v841_v7, 0.0  ;;  %v2121_v15 = vld [vmem:[#allocation14_spill] sm:$0xff]  ;;  %v2127_v54 = vld [vmem:[#allocation24_spill] sm:$0xff] }
 0x1aa   :  { %963 = vst [vmem:[#allocation2 + $0x38] sm:$0xff] %v899_v19  ;;  %v845_v62 = vadd.f32 %v1779_v58, %v778_v25  ;;  %v781_v12 = vmul.f32 %v1776_v52, %v2119_v22  ;;  %v846_v44 = vadd.f32 %v1779_v58, %v779_v1  ;;  %v906_v34 = vmax.f32 %v842_v8, 0.0  ;;  %v2128_v22 = vld [vmem:[#allocation25_spill] sm:$0xff] }
 0x1ab   :  { %964 = vst [vmem:[#allocation2 + $0x40] sm:$0xff] %v900_v59  ;;  %v782_v9 = vmul.f32 %v1776_v52, %v2120_v2  ;;  %v847_v31 = vadd.f32 %v1779_v58, %v780_v57  ;;  %v907_v17 = vmax.f32 %v843_v61, 0.0  ;;  %v783_v60 = vmul.f32 %v1776_v52, %v2121_v15  ;;  %v2129_v2 = vld [vmem:[#allocation26_spill] sm:$0xff]  ;;  %v2130_v15 = vld [vmem:[#allocation27_spill] sm:$0xff] }
 0x1ac   :  { %965 = vst [vmem:[#allocation2 + $0x48] sm:$0xff] %v901_v27  ;;  %v848_v35 = vadd.f32 %v1779_v58, %v781_v12  ;;  %v908_v19 = vmax.f32 %v844_v28, 0.0  ;;  %v784_v55 = vmul.f32 %v1776_v52, %v2122_v0  ;;  %v909_v59 = vmax.f32 %v845_v62, 0.0  ;;  %v2131_v0 = vld [vmem:[#allocation9_spill] sm:$0xff] }
 0x1ad   :  { %966 = vst [vmem:[#allocation2 + $0x50] sm:$0xff] %v902_v6  ;;  %v849_v37 = vadd.f32 %v1779_v58, %v782_v9  ;;  %v785_v11 = vmul.f32 %v1776_v52, %v2123_v63  ;;  %v850_v7 = vadd.f32 %v1779_v58, %v783_v60  ;;  %v910_v27 = vmax.f32 %v846_v44, 0.0  ;;  %v2132_v63 = vld [vmem:[#allocation11_spill] sm:$0xff] }
 0x1ae   :  { %967 = vst [vmem:[#allocation2 + $0x58] sm:$0xff] %v903_v20  ;;  %v786_v26 = vmul.f32 %v1776_v52, %v2124_v16  ;;  %v851_v8 = vadd.f32 %v1779_v58, %v784_v55  ;;  %v911_v6 = vmax.f32 %v847_v31, 0.0  ;;  %v787_v25 = vmul.f32 %v1776_v52, %v2125_v14  ;;  %v2133_v16 = vld [vmem:[#allocation13_spill] sm:$0xff]  ;;  %v2134_v14 = vld [vmem:[#allocation15_spill] sm:$0xff] }
 0x1af   :  { %968 = vst [vmem:[#allocation2 + $0x60] sm:$0xff] %v904_v51  ;;  %v852_v61 = vadd.f32 %v1779_v58, %v785_v11  ;;  %v912_v20 = vmax.f32 %v848_v35, 0.0  ;;  %v788_v1 = vmul.f32 %v1776_v52, %v2126_v47  ;;  %v913_v51 = vmax.f32 %v849_v37, 0.0  ;;  %v2135_v47 = vld [vmem:[#allocation17_spill] sm:$0xff] }
 0x1b0   :  { %969 = vst [vmem:[#allocation2 + $0x68] sm:$0xff] %v905_v3  ;;  %v853_v28 = vadd.f32 %v1779_v58, %v786_v26  ;;  %v789_v57 = vmul.f32 %v1776_v52, %v2127_v54  ;;  %v854_v62 = vadd.f32 %v1779_v58, %v787_v25  ;;  %v914_v3 = vmax.f32 %v850_v7, 0.0 }
 0x1b1   :  { %970 = vst [vmem:[#allocation2 + $0x70] sm:$0xff] %v906_v34  ;;  %v790_v12 = vmul.f32 %v1776_v52, %v2128_v22  ;;  %v855_v44 = vadd.f32 %v1779_v58, %v788_v1  ;;  %v915_v34 = vmax.f32 %v851_v8, 0.0  ;;  %v791_v9 = vmul.f32 %v1776_v52, %v2129_v2 }
 0x1b2   :  { %971 = vst [vmem:[#allocation2 + $0x78] sm:$0xff] %v907_v17  ;;  %v856_v31 = vadd.f32 %v1779_v58, %v789_v57  ;;  %v916_v17 = vmax.f32 %v852_v61, 0.0  ;;  %v792_v60 = vmul.f32 %v1776_v52, %v2130_v15  ;;  %v793_v55 = vmul.f32 %v1776_v52, %v2131_v0 }
 0x1b3   :  { %972 = vst [vmem:[#allocation2 + $0x80] sm:$0xff] %v908_v19  ;;  %v857_v35 = vadd.f32 %v1779_v58, %v790_v12  ;;  %v917_v19 = vmax.f32 %v853_v28, 0.0  ;;  %v858_v37 = vadd.f32 %v1779_v58, %v791_v9  ;;  %v794_v11 = vmul.f32 %v1776_v52, %v2132_v63 }
 0x1b4   :  { %973 = vst [vmem:[#allocation2 + $0x88] sm:$0xff] %v909_v59  ;;  %v918_v59 = vmax.f32 %v854_v62, 0.0  ;;  %v859_v7 = vadd.f32 %v1779_v58, %v792_v60  ;;  %v795_v26 = vmul.f32 %v1776_v52, %v2133_v16  ;;  %v860_v8 = vadd.f32 %v1779_v58, %v793_v55 }
 0x1b5   :  { %974 = vst [vmem:[#allocation2 + $0x90] sm:$0xff] %v910_v27  ;;  %v919_v27 = vmax.f32 %v855_v44, 0.0  ;;  %v796_v25 = vmul.f32 %v1776_v52, %v2134_v14  ;;  %v861_v61 = vadd.f32 %v1779_v58, %v794_v11  ;;  %v797_v1 = vmul.f32 %v1776_v52, %v2135_v47 }
 0x1b6   :  { %975 = vst [vmem:[#allocation2 + $0x98] sm:$0xff] %v911_v6  ;;  %v920_v6 = vmax.f32 %v856_v31, 0.0  ;;  %v862_v28 = vadd.f32 %v1779_v58, %v795_v26  ;;  %v923_v57 = vmax.f32 %v859_v7, 0.0  ;;  %v929_v52 = vmax.f32 %v1868_v24, 0.0 }
 0x1b7   :  { %976 = vst [vmem:[#allocation2 + $0xa0] sm:$0xff] %v912_v20  ;;  %v921_v20 = vmax.f32 %v857_v35, 0.0  ;;  %v863_v54 = vadd.f32 %v1779_v58, %v796_v25  ;;  %v864_v62 = vadd.f32 %v1779_v58, %v797_v1  ;;  %v925_v22 = vmax.f32 %v861_v61, 0.0 }
 0x1b8   :  { %977 = vst [vmem:[#allocation2 + $0xa8] sm:$0xff] %v913_v51  ;;  %v922_v51 = vmax.f32 %v858_v37, 0.0  ;;  %v926_v12 = vmax.f32 %v862_v28, 0.0  ;;  %v930_v2 = vmax.f32 %v1871_v38, 0.0  ;;  %v931_v9 = vmax.f32 %v1874_v4, 0.0 }
 0x1b9   :  { %978 = vst [vmem:[#allocation2 + $0xb0] sm:$0xff] %v914_v3  ;;  %v924_v3 = vmax.f32 %v860_v8, 0.0  ;;  %v927_v44 = vmax.f32 %v863_v54, 0.0  ;;  %v932_v58 = vmax.f32 %v1877_v53, 0.0  ;;  %v933_v31 = vmax.f32 %v1880_v33, 0.0 }
 0x1ba   :  { %979 = vst [vmem:[#allocation2 + $0xb8] sm:$0xff] %v915_v34  ;;  %v928_v34 = vmax.f32 %v864_v62, 0.0  ;;  %v935_v15 = vmax.f32 %v1886_v46, 0.0  ;;  %v936_v24 = vmax.f32 %v1889_v39, 0.0  ;;  %v937_v38 = vmax.f32 %v1892_v36, 0.0 }
 0x1bb   :  { %980 = vst [vmem:[#allocation2 + $0xc0] sm:$0xff] %v916_v17  ;;  %v934_v17 = vmax.f32 %v1883_v49, 0.0  ;;  %v938_v4 = vmax.f32 %v1895_v32, 0.0  ;;  %v939_v53 = vmax.f32 %v1898_v41, 0.0  ;;  %v940_v33 = vmax.f32 %v1901_v10, 0.0 }
 0x1bc   :  { %981 = vst [vmem:[#allocation2 + $0xc8] sm:$0xff] %v917_v19  ;;  %v941_v49 = vmax.f32 %v1904_v29, 0.0  ;;  %v942_v46 = vmax.f32 %v1907_v5, 0.0  ;;  %v943_v39 = vmax.f32 %v1910_v56, 0.0  ;;  %v944_v36 = vmax.f32 %v1913_v13, 0.0 }
 0x1bd   :  { %982 = vst [vmem:[#allocation2 + $0xd0] sm:$0xff] %v918_v59  ;;  %v945_v32 = vmax.f32 %v1916_v21, 0.0  ;;  %v946_v41 = vmax.f32 %v1919_v30, 0.0  ;;  %v947_v10 = vmax.f32 %v1922_v23, 0.0  ;;  %v948_v29 = vmax.f32 %v1925_v50, 0.0 }
 0x1be   :  { %983 = vst [vmem:[#allocation2 + $0xd8] sm:$0xff] %v919_v27  ;;  %v949_v5 = vmax.f32 %v1928_v43, 0.0  ;;  %v950_v56 = vmax.f32 %v1931_v18, 0.0  ;;  %v951_v13 = vmax.f32 %v1934_v40, 0.0  ;;  %v952_v21 = vmax.f32 %v1937_v42, 0.0 }
 0x1bf   :  { %984 = vst [vmem:[#allocation2 + $0xe0] sm:$0xff] %v920_v6  ;;  %v953_v30 = vmax.f32 %v1940_v45, 0.0  ;;  %v954_v23 = vmax.f32 %v1943_v48, 0.0 }
 0x1c0   :  { %985 = vst [vmem:[#allocation2 + $0xe8] sm:$0xff] %v921_v20 }
 0x1c1   :  { %986 = vst [vmem:[#allocation2 + $0xf0] sm:$0xff] %v922_v51 }
 0x1c2   :  { %987 = vst [vmem:[#allocation2 + $0xf8] sm:$0xff] %v923_v57 }
 0x1c3   :  { %988 = vst [vmem:[#allocation2 + $0x100] sm:$0xff] %v924_v3 }
 0x1c4   :  { %989 = vst [vmem:[#allocation2 + $0x108] sm:$0xff] %v925_v22 }
 0x1c5   :  { %990 = vst [vmem:[#allocation2 + $0x110] sm:$0xff] %v926_v12 }
 0x1c6   :  { %991 = vst [vmem:[#allocation2 + $0x118] sm:$0xff] %v927_v44 }
 0x1c7   :  { %992 = vst [vmem:[#allocation2 + $0x120] sm:$0xff] %v928_v34 }
 0x1c8   :  { %993 = vst [vmem:[#allocation2 + $0x128] sm:$0xff] %v929_v52 }
 0x1c9   :  { %994 = vst [vmem:[#allocation2 + $0x130] sm:$0xff] %v930_v2 }
 0x1ca   :  { %995 = vst [vmem:[#allocation2 + $0x138] sm:$0xff] %v931_v9 }
 0x1cb   :  { %996 = vst [vmem:[#allocation2 + $0x140] sm:$0xff] %v932_v58 }
 0x1cc   :  { %997 = vst [vmem:[#allocation2 + $0x148] sm:$0xff] %v933_v31 }
 0x1cd   :  { %998 = vst [vmem:[#allocation2 + $0x150] sm:$0xff] %v934_v17 }
 0x1ce   :  { %999 = vst [vmem:[#allocation2 + $0x158] sm:$0xff] %v935_v15 }
 0x1cf   :  { %1000 = vst [vmem:[#allocation2 + $0x160] sm:$0xff] %v936_v24 }
 0x1d0   :  { %1001 = vst [vmem:[#allocation2 + $0x168] sm:$0xff] %v937_v38 }
 0x1d1   :  { %1002 = vst [vmem:[#allocation2 + $0x170] sm:$0xff] %v938_v4 }
 0x1d2   :  { %1003 = vst [vmem:[#allocation2 + $0x178] sm:$0xff] %v939_v53 }
 0x1d3   :  { %1004 = vst [vmem:[#allocation2 + $0x180] sm:$0xff] %v940_v33 }
 0x1d4   :  { %1005 = vst [vmem:[#allocation2 + $0x188] sm:$0xff] %v941_v49 }
 0x1d5   :  { %1006 = vst [vmem:[#allocation2 + $0x190] sm:$0xff] %v942_v46 }
 0x1d6   :  { %1007 = vst [vmem:[#allocation2 + $0x198] sm:$0xff] %v943_v39 }
 0x1d7   :  { %1008 = vst [vmem:[#allocation2 + $0x1a0] sm:$0xff] %v944_v36 }
 0x1d8   :  { %1009 = vst [vmem:[#allocation2 + $0x1a8] sm:$0xff] %v945_v32 }
 0x1d9   :  { %1010 = vst [vmem:[#allocation2 + $0x1b0] sm:$0xff] %v946_v41 }
 0x1da   :  { %1011 = vst [vmem:[#allocation2 + $0x1b8] sm:$0xff] %v947_v10 }
 0x1db   :  { %1012 = vst [vmem:[#allocation2 + $0x1c0] sm:$0xff] %v948_v29 }
 0x1dc   :  { %1013 = vst [vmem:[#allocation2 + $0x1c8] sm:$0xff] %v949_v5 }
 0x1dd   :  { %1014 = vst [vmem:[#allocation2 + $0x1d0] sm:$0xff] %v950_v56 }
 0x1de   :  { %1015 = vst [vmem:[#allocation2 + $0x1d8] sm:$0xff] %v951_v13 }
 0x1df   :  { %1016 = vst [vmem:[#allocation2 + $0x1e0] sm:$0xff] %v952_v21 }
 0x1e0   :  { %1017 = vst [vmem:[#allocation2 + $0x1e8] sm:$0xff] %v953_v30 }
 0x1e1   :  { %1018 = vst [vmem:[#allocation2 + $0x1f0] sm:$0xff] %v954_v23 }
 0x1e2   :  { %1032 = dma.vmem_to_hbm [thread:$0]  %s1025_s4, 8192, %s1027_s12, [#allocation3], %s1286_s13, %s1286_s13, %s1287_s14  }
 0x1e3   :  { %1283 = dma.done.wait [#allocation3], 8192  }
 0x1e4   :  { %1284 = vsyncadd [#allocation3], 4294959104 }
 0x1e5   :  { %1037 = vsyncpa [#allocation3], 1 }

</bundles_post_ra>
